<compile_context>
chip_gen: v7x
topology: tpu7x:2x2x1
jax: 0.10.0
libtpu: 0.0.40
codegen_flags: <defaults>
</compile_context>

<pallas_src>
import math
import jax
import jax.numpy as jnp
from jax.experimental import pallas as pl
from jax.experimental.pallas import tpu as pltpu


def _round_up(x, m):
    return ((x + m - 1) // m) * m


def _cdiv(a, b):
    return (a + b - 1) // b


def linear_kernel(x_ref, w_ref, b_ref, o_ref):
    """One (tm, tn) output tile of y = x @ W^T + b, full-K block, f32 accumulate."""
    acc = jnp.dot(x_ref[...], w_ref[...], preferred_element_type=jnp.float32)
    o_ref[...] = (acc + b_ref[...]).astype(o_ref.dtype)


def init_logreg_params(key, ft_in, nb_classes):
    """Mirror LogReg.weights_init: xavier_uniform_ weight, zero bias (PyTorch layout)."""
    bound = math.sqrt(6.0 / (ft_in + nb_classes))
    w = jax.random.uniform(key, (nb_classes, ft_in), jnp.float32,
                           minval=-bound, maxval=bound)
    b = jnp.zeros((nb_classes,), jnp.float32)
    return w, b


def prepare_logreg_params(w, b, *, tn=128, dot_dtype=jnp.bfloat16):
    """One-time (init-time) param prep: PyTorch layout -> kernel layout.

    w: [nb_classes, ft_in], b: [nb_classes].
    Returns W^T zero-padded to [ft_in, Np] (Np = roundup(nb_classes, tn),
    lane-dense output) in dot_dtype, and bias as (1, Np) f32.
    Zero-padding the N dim is mathematically exact.
    """
    nb_classes, ft_in = w.shape
    Np = _round_up(nb_classes, tn)
    w_p = jnp.zeros((ft_in, Np), dot_dtype).at[:, :nb_classes].set(
        w.T.astype(dot_dtype))
    b_p = jnp.zeros((1, Np), jnp.float32).at[0, :nb_classes].set(
        b.astype(jnp.float32))
    return w_p, b_p


def logreg_forward(seq, w_p, b_p, nb_classes, *, tm=512, tn=128):
    """LogReg.forward: ret = seq @ W^T + b  (PyTorch nn.Linear semantics).

    seq: [..., ft_in] (leading dims flattened into rows).
    w_p, b_p: from prepare_logreg_params (already transposed/padded).
    seq is cast to w_p.dtype (bf16 default -> halves x/W HBM traffic on every
    TPU generation); the MXU accumulates in f32 and the bias add is f32.
    """
    orig_shape = seq.shape
    ft_in = orig_shape[-1]
    assert w_p.shape[0] == ft_in
    Np = w_p.shape[1]
    assert Np % tn == 0

    x = seq.reshape(-1, ft_in).astype(w_p.dtype)   # no padded copy, just cast
    M = x.shape[0]

    # M tiling: multiple of 8, no activation padding (ragged last block is
    # masked by Pallas); split into >=2 blocks when possible for v7x's 2 TCs.
    tm_eff = max(8, min(tm, _round_up(M, 8)))
    if M >= 16 and _cdiv(M, tm_eff) < 2:
        tm_eff = _round_up(_cdiv(M, 2), 8)
    grid = (_cdiv(M, tm_eff), Np // tn)

    out = pl.pallas_call(
        linear_kernel,
        out_shape=jax.ShapeDtypeStruct((M, Np), jnp.float32),
        grid_spec=pltpu.PrefetchScalarGridSpec(
            num_scalar_prefetch=0,
            grid=grid,
            in_specs=[
                # x rows, full (unpadded) K: block K == full dim -> rule waived
                pl.BlockSpec((tm_eff, ft_in), lambda i, j: (i, 0)),
                # W^T [ft_in, Np], full K, lane-dense N tile
                pl.BlockSpec((ft_in, tn), lambda i, j: (0, j)),
                # bias (1, Np) f32
                pl.BlockSpec((1, tn), lambda i, j: (0, j)),
            ],
            out_specs=pl.BlockSpec((tm_eff, tn), lambda i, j: (i, j)),
        ),
        compiler_params=pltpu.CompilerParams(
            dimension_semantics=("parallel", "parallel")),
    )(x, w_p, b_p)

    return out[:, :nb_classes].reshape(*orig_shape[:-1], nb_classes)


if __name__ == "__main__":
    # Small shapes consistent with the module: seq = [batch=2, nodes=64, ft_in=32],
    # nb_classes=7 (128 rows -> two 64-row M-blocks, one lane-dense N tile).
    ft_in, nb_classes = 32, 7
    batch, nodes = 2, 64

    root = jax.random.PRNGKey(0)
    k_seq, k_w = jax.random.split(root)

    seq = jax.random.normal(k_seq, (batch, nodes, ft_in), jnp.float32)
    w, b = init_logreg_params(k_w, ft_in, nb_classes)
    ref = seq @ w.T + b[None, None, :]

    # Default path: bf16 matmul inputs, f32 accumulation (all TPU generations).
    w_bf, b_p = prepare_logreg_params(w, b, dot_dtype=jnp.bfloat16)
    out = jax.block_until_ready(logreg_forward(seq, w_bf, b_p, nb_classes))
    assert out.shape == (batch, nodes, nb_classes)
    assert jnp.allclose(out, ref, atol=5e-2, rtol=5e-2)

    # Exact f32 path.
    w_f32, b_f32 = prepare_logreg_params(w, b, dot_dtype=jnp.float32)
    out_f32 = jax.block_until_ready(logreg_forward(seq, w_f32, b_f32, nb_classes))
    assert jnp.allclose(out_f32, ref, atol=1e-5, rtol=1e-5)

    print("KERNEL_OK")
</pallas_src>

<mosaic_0001>
module attributes {stable_mosaic.version = 11 : i64} {
  func.func @linear_kernel(%arg0: i32, %arg1: i32, %arg2: memref<64x32xbf16, #tpu.memory_space<vmem>>, %arg3: memref<32x128xbf16, #tpu.memory_space<vmem>>, %arg4: memref<1x128xf32, #tpu.memory_space<vmem>>, %arg5: memref<64x128xf32, #tpu.memory_space<vmem>>) attributes {dimension_semantics = [#tpu.dimension_semantics<parallel>, #tpu.dimension_semantics<parallel>], iteration_bounds = array<i64: 2, 1>, scalar_prefetch = 0 : i64, scratch_operands = 0 : i64, tpu.core_type = #tpu.core_type<tc>, window_params = [{transform_indices = @transform_0, window_bounds = array<i64: 64, 32>}, {transform_indices = @transform_1, window_bounds = array<i64: 32, 128>}, {transform_indices = @transform_2, window_bounds = array<i64: 1, 128>}, {transform_indices = @transform_3, window_bounds = array<i64: 64, 128>}]} {
    %c0 = arith.constant 0 : index
    %c0_0 = arith.constant 0 : index
    %0 = vector.load %arg2[%c0, %c0_0] : memref<64x32xbf16, #tpu.memory_space<vmem>>, vector<64x32xbf16>
    %c0_1 = arith.constant 0 : index
    %c0_2 = arith.constant 0 : index
    %1 = vector.load %arg3[%c0_1, %c0_2] : memref<32x128xbf16, #tpu.memory_space<vmem>>, vector<32x128xbf16>
    %cst = arith.constant dense<0.000000e+00> : vector<64x128xf32>
    %2 = tpu.matmul %0, %1, %cst {dimension_numbers = #tpu.dot_dimension_numbers<[1], [0], [0], [1], [0, 0, 1, 1], [], []>} : vector<64x32xbf16>, vector<32x128xbf16>, vector<64x128xf32> -> vector<64x128xf32>
    %c0_3 = arith.constant 0 : index
    %c0_4 = arith.constant 0 : index
    %3 = vector.load %arg4[%c0_3, %c0_4] : memref<1x128xf32, #tpu.memory_space<vmem>>, vector<1x128xf32>
    %4 = vector.broadcast %3 : vector<1x128xf32> to vector<64x128xf32>
    %5 = arith.addf %2, %4 : vector<64x128xf32>
    %c0_5 = arith.constant 0 : index
    %c0_6 = arith.constant 0 : index
    %6 = vector.load %arg5[%c0_5, %c0_6] : memref<64x128xf32, #tpu.memory_space<vmem>>, vector<64x128xf32>
    tpu.vector_store %arg5[%c0_5, %c0_6], %5 {strides = array<i32>} : memref<64x128xf32, #tpu.memory_space<vmem>>, vector<64x128xf32>,
    return
  }
  func.func @transform_0(%arg0: i32, %arg1: i32) -> (i32, i32) {
    %c0_i32 = arith.constant 0 : i32
    %c0_i32_0 = arith.constant 0 : i32
    return %arg0, %c0_i32 : i32, i32
  }
  func.func @transform_1(%arg0: i32, %arg1: i32) -> (i32, i32) {
    %c0_i32 = arith.constant 0 : i32
    %c0_i32_0 = arith.constant 0 : i32
    return %c0_i32, %arg1 : i32, i32
  }
  func.func @transform_2(%arg0: i32, %arg1: i32) -> (i32, i32) {
    %c0_i32 = arith.constant 0 : i32
    %c0_i32_0 = arith.constant 0 : i32
    return %c0_i32, %arg1 : i32, i32
  }
  func.func @transform_3(%arg0: i32, %arg1: i32) -> (i32, i32) {
    %c0_i32 = arith.constant 0 : i32
    return %arg0, %arg1 : i32, i32
  }
}

</mosaic_0001>

<bundles_post_ra>
// kernel: tpu_custom_call.1
= control target key start
LH: loop header
LB: loop body
LE: loop exit
PB: predicated region body
PF: predicated region fallthrough
CT: control target
= control target key end

     0   :  { %8 = vsyncpa [#allocation3], 0  ;;  %s811_s0 = inlined_call_operand.vmem [shape: bf16[128,32], index: 0, kind: input, shape index: {}]   ;;  %s812_s1 = inlined_call_operand.vmem [shape: bf16[32,128], index: 1, kind: input, shape index: {}]   ;;  %s813_s2 = inlined_call_operand.vmem [shape: f32[1,128], index: 2, kind: input, shape index: {}]   ;;  %s814_s3 = inlined_call_operand.hbm [shape: f32[128,128], index: 3, kind: output, shape index: {}]  }
   0x1   :  { %10 = vsyncpa [#allocation3 + $0x1], 0  ;;  %s684_s12 = smov 0   ;;  %s686_s13 = smov 0  }
   0x2   :  { %s688_s14 = smov 0   ;;  %s690_s15 = smov 0  }
   0x3   :  { %s692_s16 = smov 0   ;;  %s694_s17 = smov 0  }
   0x4 LB: > { %s469_s18 = sadd.s32 4294967295, %s659_s17   ;;  %s470_s19 = sadd.s32 4294967294, %s659_s17   ;;  %s659_s17 = sphi %s694_s17, %s16_s17   ;;  %s655_s16 = sphi %s692_s16, %s821_s16   ;;  %s651_s15 = sphi %s690_s15, %s820_s15   ;;  %s647_s14 = sphi %s688_s14, %s819_s14   ;;  %s643_s13 = sphi %s686_s13, %s818_s13   ;;  %s639_s12 = sphi %s684_s12, %s817_s12  }
   0x5   : > { %s28_s20 = sadd.s32 1, %s655_s16  ;;  %s115_s21 = sadd.s32 1, %s647_s14 }
   0x6   : > { %p30_p0 = scmp.ge.s32.totalorder %s28_s20, 2  ;;  %p125_p1 = scmp.ne.s32.totalorder %s647_s14, %s643_s13 }
   0x7   : > { %p126_p2 = scmp.eq.s32.totalorder %s469_s18, 1  ;;  %p131_p3 = scmp.ne.s32.totalorder %s643_s13, %s639_s12 }
   0x8   : > { %s823_s20 = smov (%p30_p0, %s28_s20), 0  ;;  %p132_p5 = scmp.eq.s32.totalorder %s470_s19, 1 }
   0x9   : > { %p724_p4 = por %p126_p2, %p125_p1  ;;  %s110_s23 = ssub.s32 %s655_s16, %s823_s20 }
   0xa   : > { %p475_p6 = scmp.ge.s32.totalorder %s659_s17, 1  ;;  %p113_p7 = scmp.eq.s32.totalorder %s110_s23, 0 }
   0xb   : > { %p731_p8 = por %p132_p5, %p131_p3  ;;  %p172_p9 = scmp.lt.s32.totalorder %s659_s17, 3 }
   0xc   : > { %s737_s25 = scalar_select %p113_p7, %s647_s14, %s115_s21  }
   0xd   : > { %p173_p10 = pnand %p475_p6, %p172_p9 }
   0xe   : > { %v575_v0 = vld [vmem:[%s812_s1] sm:$0xff] (!%p173_p10)   ;;  %s477_s28 = sshll.u32 (!%p173_p10), %s651_s15, 3  ;;  %v576_v1 = vld [vmem:[%s812_s1 + $0x8] sm:$0xff] (!%p173_p10)   ;;  %vm269_vm0 = vcmask (!%p173_p10), 261120   ;;  %s200_s8 = sand.u32 (!%p173_p10), 1, %s643_s13  }
   0xf   : > { %176 = sbr.rel (%p173_p10) target bundleno = 259 (0x103), region = 32  ;;  %p204_p11 = scmp.lt.s32.totalorder (!%p173_p10), %s477_s28, 15  ;;  %502 = vmatprep.subr.bf16.mxu0 (!%p173_p10), %v575_v0  ;;  %514 = vmatprep.subr.bf16.mxu1 (!%p173_p10), %v575_v0  ;;  %v479_v6 = vld [vmem:[%s813_s2] ss:$0 sm:$0xff] (!%p173_p10) }
  0x10   : > { %503 = vmatpush3.bf16.msra.mxu0 (!%p173_p10), %v575_v0  ;;  %516 = vmatpush3.bf16.msra.mxu1 (!%p173_p10), %v575_v0  ;;  %s476_s9 = sshll.u32 (!%p173_p10), %s200_s8, 6  ;;  %s495_s18 = sshll.u32 (!%p173_p10), %s651_s15, 10 }
  0x11   : > { %504 = vmatprep.subr.bf16.mxu0 (!%p173_p10), %v576_v1  ;;  %515 = vmatprep.subr.bf16.mxu1 (!%p173_p10), %v576_v1  ;;  %s202_s19 = scalar_lea.vmem (!%p173_p10), [#allocation2], %s476_s9  ;;  %s759_s26 = scalar_lea.hbm (!%p173_p10), %s814_s3, %s495_s18 }
  0x12   : > { %s370_s21 = sshll.u32 (!%p173_p10), %s202_s19, 4  ;;  %s765_s27 = scalar_lea.sflag (!%p173_p10), [#allocation3], %s200_s8  ;;  %s761_s21 = int_to_ptr.vmem [resolvable:$true] %s370_s21 }
  0x13   : > { %s661_s29 = smov (!%p173_p10), [#allocation2]  }
  0x14   : > { %505 = vmatpush3.bf16.msra.mxu0 (!%p173_p10), %v576_v1  ;;  %517 = vmatpush3.bf16.msra.mxu1 (!%p173_p10), %v576_v1  ;;  %s585_s30 = sshll.u32 (!%p173_p10), %s661_s29, 4  ;;  %s586_s30 = int_to_ptr.vmem [resolvable:$false] %s585_s30 }
  0x15   : > { %p588_p1 = scmp.lt.s32.totalorder (!%p173_p10), %s761_s21, %s586_s30 }
  0x16   : > { %s825_s28 = smov (!%p204_p11, %s477_s28), 15 }
  0x17   : > { %s478_s4 = sshll.u32 %s825_s28, 2  ;;  %s581_s28 = scalar_lea.vmem %s761_s21, 1024 }
  0x18   : > { %s207_s7 = scalar_lea.vmem %s811_s0, %s478_s4  ;;  %p582_p12 = scmp.ne.s32.totalorder %s761_s21, %s581_s28 }
  0x19   : > { %v577_v2 = vld [vmem:[%s207_s7] sm:$0xff]   ;;  %v578_v3 = vld [vmem:[%s207_s7 + $0x10] sm:$0xff]   ;;  %v579_v4 = vld [vmem:[%s207_s7 + $0x8] sm:$0xff]   ;;  %s587_s4 = scalar_lea.vmem %s586_s30, 2048 }
  0x1a   : > { %506 = vmatprep.mubr.msk.bf16.mxu0 %vm269_vm0, %v577_v2  ;;  %510 = vmatprep.mubr.msk.bf16.mxu1 %vm269_vm0, %v578_v3  ;;  %v580_v5 = vld [vmem:[%s207_s7 + $0x18] sm:$0xff]   ;;  %p583_p13 = pnand %p582_p12, %p724_p4  ;;  %p589_p2 = scmp.lt.s32.totalorder %s587_s4, %s581_s28 }
  0x1b   : > { %507 = vmatmul.mubr.msk.bf16.vlgmr.msra.gmra.mrb[0].mxu0 %vm269_vm0, %v579_v4  ;;  %511 = vmatmul.mubr.msk.bf16.vlgmr.msra.gmra.mrb[0].mxu1 %vm269_vm0, %v580_v5 }
  0x1c   : > { %p584_p0 = pneg %p583_p13  ;;  %p590_p3 = por %p589_p2, %p588_p1 }
  0x1e   : > { %p591_p5 = pnand %p590_p3, %p584_p0 }
  0xee   : > { %v508_v7 = vpop.f32.mrb[0].mxu0  ;;  %v512_v9 = vpop.f32.mrb[0].mxu1 }
  0xef   : > { %v325_v8 = vadd.f32 %v508_v7, %v479_v6  ;;  %v316_v10 = vpop.f32.mrb[1].mxu0  ;;  %v341_v11 = vadd.f32 %v512_v9, %v479_v6  ;;  %v332_v13 = vpop.f32.mrb[1].mxu1 }
  0xf0   : > { %v317_v12 = vadd.f32 %v479_v6, %v316_v10  ;;  %v509_v14 = vpop.f32.mrb[2].mxu0  ;;  %v333_v15 = vadd.f32 %v479_v6, %v332_v13  ;;  %v513_v17 = vpop.f32.mrb[2].mxu1 }
  0xf1   : > { %349 = vst [vmem:[%s202_s19 + $0x10] sm:$0xff] %v325_v8  ;;  %v328_v16 = vadd.f32 %v509_v14, %v479_v6  ;;  %v319_v18 = vpop.f32.mrb[3].mxu0  ;;  %353 = vst [vmem:[%s202_s19 + $0x30] sm:$0xff] %v341_v11  ;;  %v344_v19 = vadd.f32 %v513_v17, %v479_v6  ;;  %v335_v21 = vpop.f32.mrb[3].mxu1 }
  0xf2   : > { %347 = vst [vmem:[%s202_s19] sm:$0xff] %v317_v12  ;;  %v320_v20 = vadd.f32 %v479_v6, %v319_v18  ;;  %351 = vst [vmem:[%s202_s19 + $0x20] sm:$0xff] %v333_v15  ;;  %v336_v22 = vadd.f32 %v479_v6, %v335_v21 }
  0xf3   : > { %350 = vst [vmem:[%s202_s19 + $0x18] sm:$0xff] %v328_v16  ;;  %354 = vst [vmem:[%s202_s19 + $0x38] sm:$0xff] %v344_v19 }
  0xf4   : > { %348 = vst [vmem:[%s202_s19 + $0x8] sm:$0xff] %v320_v20  ;;  %352 = vst [vmem:[%s202_s19 + $0x28] sm:$0xff] %v336_v22 }
  0xf5   : > { %594 = shalt.err (!%p591_p5)
}
  0xf6   : > { %s595_s5 = scalar_lea.hbm %s759_s26, 1024  ;;  %s599_s8 = scalar_lea.hbm %s814_s3, 2048 }
  0xf7   : > { %p596_p6 = scmp.ne.s32.totalorder %s759_s26, %s595_s5  ;;  %p600_p10 = scmp.lt.u32.totalorder %s759_s26, %s814_s3 }
  0xf8   : > { %p601_p11 = scmp.lt.u32.totalorder %s599_s8, %s595_s5  ;;  %p603_p13 = scmp.lt.u32.totalorder %s595_s5, %s759_s26 }
  0xf9   : > { %p597_p7 = pnand %p596_p6, %p724_p4 }
  0xfa   : > { %p602_p12 = por %p601_p11, %p600_p10 }
  0xfb   : > { %p598_p9 = pneg %p597_p7 }
  0xfc   : > { %p604_p0 = por %p603_p13, %p602_p12 }
  0xfe   : > { %p605_p1 = pnand %p604_p0, %p598_p9 }
 0x100   : > { %608 = shalt.err (!%p605_p1)
}
 0x101   : > { %s662_s11 = smov 128   ;;  %s663_s18 = smov 8  }
 0x102   : > { %518 = dma.vmem_to_hbm [thread:$0]  (%p724_p4), %s761_s21, 1024, %s759_s26, %s765_s27, %s662_s11, %s662_s11, %s663_s18  }
 0x103 PF: > { %p524_p2 = scmp.ge.s32.totalorder %s659_s17, 2  ;;  %s385_s19 = sand.u32 1, %s639_s12  }
 0x104   : > { %s386_s23 = scalar_lea.sflag [#allocation3], %s385_s19 }
 0x105   : > { %p521_p3 = pnand %p524_p2, %p731_p8 }
 0x107   : > { %634 = dma.done.wait (!%p521_p3), %s386_s23, 1024  }
 0x108   : > { %636 = vsyncadd (!%p521_p3), %s386_s23, 4294966272  ;;  %s16_s17 = sadd.s32 1, %s659_s17   ;;  %s817_s12 = smov %s643_s13 }
 0x109   : > { %p13_p5 = scmp.ge.s32.totalorder %s16_s17, 4   ;;  %s818_s13 = smov %s647_s14 }
 0x10a   : > { %s819_s14 = smov %s737_s25  ;;  %s820_s15 = smov %s655_s16 }
 0x10b   : > { %s821_s16 = smov %s823_s20  ;;  %15 = sbr.rel (!%p13_p5) target bundleno = 4 (0x4), region = 73 }
 0x112   :  { %391 = vsyncpa [#allocation3], 1 }
 0x113   :  { %393 = vsyncpa [#allocation3 + $0x1], 1 }

</bundles_post_ra>
